<compile_context>
chip_gen: v7x
topology: tpu7x:2x2x1
jax: 0.10.0
libtpu: 0.0.40
codegen_flags: <defaults>
</compile_context>

<pallas_src>
import functools
import math

import jax
import jax.numpy as jnp
from jax import lax
from jax.experimental import pallas as pl
from jax.experimental.pallas import tpu as pltpu


def _round_up(a, b):
    return -(-a // b) * b


def _vmem_and_tl():
    """(vmem_limit_bytes, max output tile) chosen per TPU generation."""
    try:
        cap = int(pltpu.get_tpu_info().vmem_capacity_bytes)
    except Exception:
        cap = 64 * 1024 * 1024
    if cap >= 100 * 1024 * 1024:          # v5e / v6e class (128 MiB VMEM)
        return 80 * 1024 * 1024, 1024
    return 40 * 1024 * 1024, 512          # v7x class (64 MiB VMEM)


# ------------------------------ Pallas kernel --------------------------------

def _polyphase_kernel(xm_ref, xh_ref, w_ref, b_ref, o_ref, *, d_off, Kmax, s, im2col):
    # xm_ref: (1, C_in_p, B) bf16      main input tile
    # xh_ref: (1, C_in_p, H) bf16      halo block (the tail of the window)
    # w_ref : im2col -> (P, C_out_blk, Kmax*C_in_p) bf16
    #         else   -> (P, Kmax, C_out_blk, C_in_p) bf16
    # b_ref : (C_out_blk, 1) f32
    # o_ref : (1, P, C_out_blk, TL)    output, one sub-block per phase
    C_in_p = xm_ref.shape[1]
    P = o_ref.shape[1]
    TL = o_ref.shape[3]
    span = s * (TL - 1) + 1

    xcat = jnp.concatenate([xm_ref[0], xh_ref[0]], axis=-1)      # (C_in_p, B + H)
    bias = b_ref[...]                                            # (C_out_blk, 1) f32

    for r in range(P):                                           # static unroll
        base = d_off[r]
        if im2col:
            taps = []
            for j in range(Kmax):
                if s == 1:
                    taps.append(xcat[:, base + j:base + j + TL])
                else:
                    taps.append(lax.slice(xcat, (0, base + j),
                                          (C_in_p, base + j + span), (1, s)))
            patch = jnp.concatenate(taps, axis=0)                # (Kmax*C_in_p, TL)
            acc = jnp.dot(w_ref[r], patch, preferred_element_type=jnp.float32)
        else:
            acc = jnp.zeros(o_ref.shape[2:], jnp.float32)
            for j in range(Kmax):
                if s == 1:
                    xs = xcat[:, base + j:base + j + TL]
                else:
                    xs = lax.slice(xcat, (0, base + j),
                                   (C_in_p, base + j + span), (1, s))
                acc = acc + jnp.dot(w_ref[r, j], xs, preferred_element_type=jnp.float32)
        o_ref[0, r] = (acc + bias).astype(o_ref.dtype)


# --------------------------- unified polyphase driver ------------------------

def _polyphase_conv(x, w_stack, bias, d_list, s, L_out):
    """x: (N, C_in, L) f32.  w_stack: (P, C_out, C_in, Kmax) f32 per-phase taps.
    bias: (C_out,) f32.  d_list[r]: input offset of phase r (in x samples).
    Phase r: y[n, :, q*P + r] = b + sum_m w_stack[r, :, :, m] . x[n, :, q*s + d_r + m]
    (x read as zero outside [0, L)).  Returns (N, C_out, L_out) in x.dtype."""
    N, C_in, L = x.shape
    P, C_out, _, Kmax = w_stack.shape

    d_min = min(d_list)
    d_off = tuple(int(d - d_min) for d in d_list)
    dd = max(d_off)

    C_in_p = _round_up(C_in, 8)          # sublane-aligned tap stride for the im2col path
    im2col = C_in_p < 128                # large C_in -> per-tap matmul accumulation

    vmem_limit, tl_cap = _vmem_and_tl()
    Q = -(-L_out // P)                                   # per-phase output length
    halo_need = dd + Kmax
    TL = min(tl_cap, _round_up(max(Q, 1), 128))
    TL = max(TL, _round_up(-(-halo_need // s), 128))     # keep halo <= one main block
    T = -(-Q // TL)
    B = TL * s
    H = _round_up(halo_need, 128)
    if H > B or B % H:
        H = B
    L_pad = T * B + H

    # ---- C_out blocking (bounds the weight block on v7x's 64 MiB VMEM) -------
    bytes_per_co_row = P * Kmax * C_in_p * 2             # bf16
    cap_co = _round_up(C_out, 16)
    co_blk = 16
    while (co_blk * 2 <= min(cap_co, 256)
           and (co_blk * 2) * bytes_per_co_row <= 6 * 1024 * 1024):
        co_blk *= 2
    C_out_p = _round_up(C_out, co_blk)
    CO = C_out_p // co_blk

    # ---- pad x once (channels -> C_in_p, shift by d_min, zero halo) and cast bf16
    left = max(0, -d_min)
    crop = x[:, :, max(0, d_min):]
    keep = min(crop.shape[-1], L_pad - left)
    crop = crop[:, :, :keep]
    x_pad = jnp.pad(crop, ((0, 0), (0, C_in_p - C_in), (left, L_pad - left - keep)))
    x_pad = x_pad.astype(jnp.bfloat16)

    # ---- weights / bias (params stay f32; only matmul operands are cast) -----
    wsf = jnp.zeros((P, C_out_p, C_in_p, Kmax), jnp.float32)
    wsf = wsf.at[:, :C_out, :C_in, :].set(w_stack.astype(jnp.float32))
    if im2col:
        # rows ordered tap-major with stride C_in_p (matches the kernel's patch build)
        w_arr = jnp.transpose(wsf, (0, 1, 3, 2)).reshape(P, C_out_p, Kmax * C_in_p)
        w_arr = w_arr.astype(jnp.bfloat16)
        w_block = (P, co_blk, Kmax * C_in_p)
        w_index = lambda co, n, t: (0, co, 0)
    else:
        w_arr = jnp.transpose(wsf, (0, 3, 1, 2)).astype(jnp.bfloat16)  # (P,Kmax,C_out_p,C_in_p)
        w_block = (P, Kmax, co_blk, C_in_p)
        w_index = lambda co, n, t: (0, 0, co, 0)
    b_p = jnp.zeros((C_out_p, 1), jnp.float32).at[:C_out, 0].set(bias.astype(jnp.float32))

    kernel = functools.partial(_polyphase_kernel, d_off=d_off, Kmax=Kmax, s=s,
                               im2col=im2col)
    hb = B // H
    out = pl.pallas_call(
        kernel,
        out_shape=jax.ShapeDtypeStruct((N, P, C_out_p, T * TL), x.dtype),
        grid=(CO, N, T),
        in_specs=[
            pl.BlockSpec((1, C_in_p, B), lambda co, n, t: (n, 0, t)),
            pl.BlockSpec((1, C_in_p, H), lambda co, n, t: (n, 0, (t + 1) * hb)),
            pl.BlockSpec(w_block, w_index),
            pl.BlockSpec((co_blk, 1), lambda co, n, t: (co, 0)),
        ],
        out_specs=pl.BlockSpec((1, P, co_blk, TL), lambda co, n, t: (n, 0, co, t)),
        compiler_params=pltpu.CompilerParams(
            dimension_semantics=("parallel", "parallel", "parallel"),
            vmem_limit_bytes=vmem_limit),
    )(x_pad, x_pad, w_arr, b_p)

    # interleave the P phases: y[n, c, q*P + r] = out[n, r, c, q]
    y = out[:, :, :C_out, :]
    y = jnp.transpose(y, (0, 2, 3, 1)).reshape(N, C_out, T * TL * P)
    return y[:, :, :L_out]


# ------------------------- per-branch weight preparation ---------------------

def _tconv_phase_weights(W, stride, padding):
    """ConvTranspose1d weight W (C_in, C_out, K) -> per-phase stride-1 taps."""
    C_in, C_out, K = W.shape
    S, Pd = stride, padding
    ds, ws, Kmax = [], [], 1
    for r in range(S):
        k0 = (r + Pd) % S
        if k0 >= K:
            ds.append(0)
            ws.append(jnp.zeros((C_out, C_in, 0), W.dtype))
            continue
        Kr = (K - 1 - k0) // S + 1
        c = (r + Pd - k0) // S
        ds.append(c - (Kr - 1))
        taps = jnp.transpose(W[:, :, k0::S], (1, 0, 2))          # (C_out, C_in, Kr)
        ws.append(jnp.flip(taps, axis=2))                        # m = Kr-1-j
        Kmax = max(Kmax, Kr)
    w_stack = jnp.stack([jnp.pad(w, ((0, 0), (0, 0), (0, Kmax - w.shape[2])))
                         for w in ws])                           # (S, C_out, C_in, Kmax)
    return w_stack, ds, 1


def _upsample_phase_weights(W, U, cs, K):
    """Conv1d weight W (C_out, C_in, K) applied after nearest-Upsample(U) and
    ConstantPad1d(K//2): fold the upsample into per-phase weights on original x."""
    C_out, C_in, _ = W.shape
    rp = K // 2
    g = math.gcd(cs, U)
    P, s = U // g, cs // g
    ds, ws, Kmax = [], [], 1
    for r in range(P):
        e = [(r * cs + k - rp) // U for k in range(K)]           # python floor div
        d = min(e)
        Kr = max(e) - d + 1
        w_r = jnp.zeros((C_out, C_in, Kr), W.dtype)
        for k in range(K):
            w_r = w_r.at[:, :, e[k] - d].add(W[:, :, k])
        ds.append(d)
        ws.append(w_r)
        Kmax = max(Kmax, Kr)
    w_stack = jnp.stack([jnp.pad(w, ((0, 0), (0, 0), (0, Kmax - w.shape[2])))
                         for w in ws])                           # (P, C_out, C_in, Kmax)
    return w_stack, ds, s


# -------------------------------- Module port --------------------------------

class Transpose1dLayerPallas:
    def __init__(self, in_channels, out_channels, kernel_size, stride,
                 padding=11, upsample=None, output_padding=1, *, key):
        self.in_channels = in_channels
        self.out_channels = out_channels
        self.kernel_size = kernel_size
        self.stride = stride
        self.padding = padding
        self.upsample = upsample
        self.output_padding = output_padding

        k1, k2, k3, k4 = jax.random.split(key, 4)
        scale = (in_channels * kernel_size) ** -0.5
        # nn.Conv1d(in, out, K, stride): weight (out, in, K), bias (out,)  -- kept f32
        self.conv_w = scale * jax.random.normal(
            k1, (out_channels, in_channels, kernel_size), jnp.float32)
        self.conv_b = scale * jax.random.normal(k2, (out_channels,), jnp.float32)
        # nn.ConvTranspose1d(in, out, K, stride, padding, out_pad): weight (in, out, K)
        self.tconv_w = scale * jax.random.normal(
            k3, (in_channels, out_channels, kernel_size), jnp.float32)
        self.tconv_b = scale * jax.random.normal(k4, (out_channels,), jnp.float32)

    def __call__(self, x):
        L = x.shape[-1]
        K = self.kernel_size
        if self.upsample:
            U = int(self.upsample)
            cs = self.stride
            rp = K // 2
            L_out = (L * U + 2 * rp - K) // cs + 1
            w_stack, ds, s = _upsample_phase_weights(self.conv_w, U, cs, K)
            return _polyphase_conv(x, w_stack, self.conv_b, ds, s, L_out)
        S, Pd, OP = self.stride, self.padding, self.output_padding
        L_out = (L - 1) * S - 2 * Pd + K + OP
        w_stack, ds, s = _tconv_phase_weights(self.tconv_w, S, Pd)
        return _polyphase_conv(x, w_stack, self.tconv_b, ds, s, L_out)


# --------------------------------- References ---------------------------------

def _ref_tconv(x, W, b, stride, padding, output_padding):
    K = W.shape[2]
    w_eq = jnp.transpose(jnp.flip(W, axis=2), (1, 0, 2))
    pad_l = K - 1 - padding
    y = lax.conv_general_dilated(
        x, w_eq, window_strides=(1,), padding=[(pad_l, pad_l + output_padding)],
        lhs_dilation=(stride,), rhs_dilation=(1,),
        dimension_numbers=("NCH", "OIH", "NCH"), precision=lax.Precision.HIGHEST)
    return y + b.reshape(1, -1, 1)


def _ref_upsample_conv(x, W, b, U, stride, K):
    rp = K // 2
    xu = jnp.repeat(x, U, axis=-1)
    xp = jnp.pad(xu, ((0, 0), (0, 0), (rp, rp)))
    y = lax.conv_general_dilated(
        xp, W, window_strides=(stride,), padding=[(0, 0)],
        dimension_numbers=("NCH", "OIH", "NCH"), precision=lax.Precision.HIGHEST)
    return y + b.reshape(1, -1, 1)


# ------------------------------------ Main ------------------------------------

if __name__ == "__main__":
    root = jax.random.PRNGKey(0)
    k1, k2, k3, kx = jax.random.split(root, 4)

    def bf16(v):  # operand rounding used inside the kernel, applied to the reference
        return v.astype(jnp.bfloat16).astype(jnp.float32)

    B_, C_in, C_out, L = 2, 4, 3, 16
    x = jax.random.normal(kx, (B_, C_in, L), jnp.float32)

    # ---- 1) ConvTranspose1d branch (K=25, stride=4, padding=11, out_pad=1) ----
    layer_t = Transpose1dLayerPallas(C_in, C_out, 25, 4, padding=11,
                                     upsample=None, output_padding=1, key=k1)
    y_t = jax.block_until_ready(layer_t(x))
    L_out_t = (L - 1) * 4 - 2 * 11 + 25 + 1
    assert y_t.shape == (B_, C_out, L_out_t), y_t.shape
    ref_t = _ref_tconv(bf16(x), bf16(layer_t.tconv_w), layer_t.tconv_b, 4, 11, 1)
    assert jnp.allclose(y_t, ref_t, atol=2e-3, rtol=2e-3), \
        float(jnp.max(jnp.abs(y_t - ref_t)))

    # ---- 2) Upsample(2) -> ConstantPad1d(12) -> Conv1d(K=25, stride=1) branch ----
    layer_u = Transpose1dLayerPallas(C_in, C_out, 25, 1, padding=11,
                                     upsample=2, output_padding=1, key=k2)
    y_u = jax.block_until_ready(layer_u(x))
    assert y_u.shape == (B_, C_out, (L * 2 + 2 * 12) - 25 + 1), y_u.shape
    ref_u = _ref_upsample_conv(bf16(x), bf16(layer_u.conv_w), layer_u.conv_b, 2, 1, 25)
    # kernel folds taps in f32 then rounds to bf16 (reference rounds per-tap) -> looser tol
    assert jnp.allclose(y_u, ref_u, atol=5e-2, rtol=5e-2), \
        float(jnp.max(jnp.abs(y_u - ref_u)))

    # ---- 3) large-C_in path (per-tap matmul accumulation, no im2col patch) ----
    C_in3, C_out3, L3 = 128, 8, 16
    x3 = jax.random.normal(jax.random.PRNGKey(7), (1, C_in3, L3), jnp.float32)
    layer_3 = Transpose1dLayerPallas(C_in3, C_out3, 25, 4, padding=11,
                                     upsample=None, output_padding=1, key=k3)
    y_3 = jax.block_until_ready(layer_3(x3))
    ref_3 = _ref_tconv(bf16(x3), bf16(layer_3.tconv_w), layer_3.tconv_b, 4, 11, 1)
    assert y_3.shape == ref_3.shape, (y_3.shape, ref_3.shape)
    assert jnp.allclose(y_3, ref_3, atol=2e-3, rtol=2e-3), \
        float(jnp.max(jnp.abs(y_3 - ref_3)))

    print("KERNEL_OK")
</pallas_src>

<mosaic_0001>
module attributes {stable_mosaic.version = 11 : i64} {
  func.func @_polyphase_kernel(%arg0: i32, %arg1: i32, %arg2: i32, %arg3: memref<1x8x128xbf16, #tpu.memory_space<vmem>>, %arg4: memref<1x8x128xbf16, #tpu.memory_space<vmem>>, %arg5: memref<4x16x56xbf16, #tpu.memory_space<vmem>>, %arg6: memref<16x1xf32, #tpu.memory_space<vmem>>, %arg7: memref<1x4x16x128xf32, #tpu.memory_space<vmem>>) attributes {dimension_semantics = [#tpu.dimension_semantics<parallel>, #tpu.dimension_semantics<parallel>, #tpu.dimension_semantics<parallel>], iteration_bounds = array<i64: 1, 2, 1>, scalar_prefetch = 0 : i64, scratch_operands = 0 : i64, tpu.core_type = #tpu.core_type<tc>, window_params = [{transform_indices = @transform_0, window_bounds = array<i64: 1, 8, 128>}, {transform_indices = @transform_1, window_bounds = array<i64: 1, 8, 128>}, {transform_indices = @transform_2, window_bounds = array<i64: 4, 16, 56>}, {transform_indices = @transform_3, window_bounds = array<i64: 16, 1>}, {transform_indices = @transform_4, window_bounds = array<i64: 1, 4, 16, 128>}]} {
    %c0 = arith.constant 0 : index
    %c0_0 = arith.constant 0 : index
    %c0_1 = arith.constant 0 : index
    %0 = vector.load %arg3[%c0, %c0_0, %c0_1] : memref<1x8x128xbf16, #tpu.memory_space<vmem>>, vector<1x8x128xbf16>
    %1 = vector.shape_cast %0 : vector<1x8x128xbf16> to vector<8x128xbf16>
    %c0_2 = arith.constant 0 : index
    %c0_3 = arith.constant 0 : index
    %c0_4 = arith.constant 0 : index
    %2 = vector.load %arg4[%c0_2, %c0_3, %c0_4] : memref<1x8x128xbf16, #tpu.memory_space<vmem>>, vector<1x8x128xbf16>
    %3 = vector.shape_cast %2 : vector<1x8x128xbf16> to vector<8x128xbf16>
    %4 = tpu.concatenate %1, %3 in 1 : vector<8x128xbf16>, vector<8x128xbf16> -> vector<8x256xbf16>
    %c0_5 = arith.constant 0 : index
    %c0_6 = arith.constant 0 : index
    %5 = vector.load %arg6[%c0_5, %c0_6] : memref<16x1xf32, #tpu.memory_space<vmem>>, vector<16x1xf32>
    %6 = vector.extract_strided_slice %4 {offsets = [0, 0], sizes = [8, 128], strides = [1, 1]} : vector<8x256xbf16> to vector<8x128xbf16>
    %7 = vector.extract_strided_slice %4 {offsets = [0, 1], sizes = [8, 128], strides = [1, 1]} : vector<8x256xbf16> to vector<8x128xbf16>
    %8 = vector.extract_strided_slice %4 {offsets = [0, 2], sizes = [8, 128], strides = [1, 1]} : vector<8x256xbf16> to vector<8x128xbf16>
    %9 = vector.extract_strided_slice %4 {offsets = [0, 3], sizes = [8, 128], strides = [1, 1]} : vector<8x256xbf16> to vector<8x128xbf16>
    %10 = vector.extract_strided_slice %4 {offsets = [0, 4], sizes = [8, 128], strides = [1, 1]} : vector<8x256xbf16> to vector<8x128xbf16>
    %11 = vector.extract_strided_slice %4 {offsets = [0, 5], sizes = [8, 128], strides = [1, 1]} : vector<8x256xbf16> to vector<8x128xbf16>
    %12 = vector.extract_strided_slice %4 {offsets = [0, 6], sizes = [8, 128], strides = [1, 1]} : vector<8x256xbf16> to vector<8x128xbf16>
    %13 = tpu.concatenate %6, %7, %8, %9, %10, %11, %12 in 0 : vector<8x128xbf16>, vector<8x128xbf16>, vector<8x128xbf16>, vector<8x128xbf16>, vector<8x128xbf16>, vector<8x128xbf16>, vector<8x128xbf16> -> vector<56x128xbf16>
    %c0_7 = arith.constant 0 : index
    %c0_8 = arith.constant 0 : index
    %c0_9 = arith.constant 0 : index
    %14 = vector.load %arg5[%c0_7, %c0_8, %c0_9] : memref<4x16x56xbf16, #tpu.memory_space<vmem>>, vector<1x16x56xbf16>
    %15 = vector.shape_cast %14 : vector<1x16x56xbf16> to vector<16x56xbf16>
    %cst = arith.constant dense<0.000000e+00> : vector<16x128xf32>
    %16 = tpu.matmul %15, %13, %cst {dimension_numbers = #tpu.dot_dimension_numbers<[1], [0], [0], [1], [0, 0, 1, 1], [], []>} : vector<16x56xbf16>, vector<56x128xbf16>, vector<16x128xf32> -> vector<16x128xf32>
    %17 = vector.broadcast %5 : vector<16x1xf32> to vector<16x128xf32>
    %18 = arith.addf %16, %17 : vector<16x128xf32>
    %c0_10 = arith.constant 0 : index
    %c0_11 = arith.constant 0 : index
    %c0_12 = arith.constant 0 : index
    %c0_13 = arith.constant 0 : index
    %19 = vector.load %arg7[%c0_10, %c0_11, %c0_12, %c0_13] : memref<1x4x16x128xf32, #tpu.memory_space<vmem>>, vector<1x1x16x128xf32>
    %20 = vector.shape_cast %19 : vector<1x1x16x128xf32> to vector<16x128xf32>
    %21 = vector.shape_cast %18 : vector<16x128xf32> to vector<1x1x16x128xf32>
    tpu.vector_store %arg7[%c0_10, %c0_11, %c0_12, %c0_13], %21 {strides = array<i32>} : memref<1x4x16x128xf32, #tpu.memory_space<vmem>>, vector<1x1x16x128xf32>,
    %22 = vector.extract_strided_slice %4 {offsets = [0, 0], sizes = [8, 128], strides = [1, 1]} : vector<8x256xbf16> to vector<8x128xbf16>
    %23 = vector.extract_strided_slice %4 {offsets = [0, 1], sizes = [8, 128], strides = [1, 1]} : vector<8x256xbf16> to vector<8x128xbf16>
    %24 = vector.extract_strided_slice %4 {offsets = [0, 2], sizes = [8, 128], strides = [1, 1]} : vector<8x256xbf16> to vector<8x128xbf16>
    %25 = vector.extract_strided_slice %4 {offsets = [0, 3], sizes = [8, 128], strides = [1, 1]} : vector<8x256xbf16> to vector<8x128xbf16>
    %26 = vector.extract_strided_slice %4 {offsets = [0, 4], sizes = [8, 128], strides = [1, 1]} : vector<8x256xbf16> to vector<8x128xbf16>
    %27 = vector.extract_strided_slice %4 {offsets = [0, 5], sizes = [8, 128], strides = [1, 1]} : vector<8x256xbf16> to vector<8x128xbf16>
    %28 = vector.extract_strided_slice %4 {offsets = [0, 6], sizes = [8, 128], strides = [1, 1]} : vector<8x256xbf16> to vector<8x128xbf16>
    %29 = tpu.concatenate %22, %23, %24, %25, %26, %27, %28 in 0 : vector<8x128xbf16>, vector<8x128xbf16>, vector<8x128xbf16>, vector<8x128xbf16>, vector<8x128xbf16>, vector<8x128xbf16>, vector<8x128xbf16> -> vector<56x128xbf16>
    %c1 = arith.constant 1 : index
    %c0_14 = arith.constant 0 : index
    %c0_15 = arith.constant 0 : index
    %30 = vector.load %arg5[%c1, %c0_14, %c0_15] : memref<4x16x56xbf16, #tpu.memory_space<vmem>>, vector<1x16x56xbf16>
    %31 = vector.shape_cast %30 : vector<1x16x56xbf16> to vector<16x56xbf16>
    %cst_16 = arith.constant dense<0.000000e+00> : vector<16x128xf32>
    %32 = tpu.matmul %31, %29, %cst_16 {dimension_numbers = #tpu.dot_dimension_numbers<[1], [0], [0], [1], [0, 0, 1, 1], [], []>} : vector<16x56xbf16>, vector<56x128xbf16>, vector<16x128xf32> -> vector<16x128xf32>
    %33 = vector.broadcast %5 : vector<16x1xf32> to vector<16x128xf32>
    %34 = arith.addf %32, %33 : vector<16x128xf32>
    %c0_17 = arith.constant 0 : index
    %c1_18 = arith.constant 1 : index
    %c0_19 = arith.constant 0 : index
    %c0_20 = arith.constant 0 : index
    %35 = vector.load %arg7[%c0_17, %c1_18, %c0_19, %c0_20] : memref<1x4x16x128xf32, #tpu.memory_space<vmem>>, vector<1x1x16x128xf32>
    %36 = vector.shape_cast %35 : vector<1x1x16x128xf32> to vector<16x128xf32>
    %37 = vector.shape_cast %34 : vector<16x128xf32> to vector<1x1x16x128xf32>
    tpu.vector_store %arg7[%c0_17, %c1_18, %c0_19, %c0_20], %37 {strides = array<i32>} : memref<1x4x16x128xf32, #tpu.memory_space<vmem>>, vector<1x1x16x128xf32>,
    %38 = vector.extract_strided_slice %4 {offsets = [0, 1], sizes = [8, 128], strides = [1, 1]} : vector<8x256xbf16> to vector<8x128xbf16>
    %39 = vector.extract_strided_slice %4 {offsets = [0, 2], sizes = [8, 128], strides = [1, 1]} : vector<8x256xbf16> to vector<8x128xbf16>
    %40 = vector.extract_strided_slice %4 {offsets = [0, 3], sizes = [8, 128], strides = [1, 1]} : vector<8x256xbf16> to vector<8x128xbf16>
    %41 = vector.extract_strided_slice %4 {offsets = [0, 4], sizes = [8, 128], strides = [1, 1]} : vector<8x256xbf16> to vector<8x128xbf16>
    %42 = vector.extract_strided_slice %4 {offsets = [0, 5], sizes = [8, 128], strides = [1, 1]} : vector<8x256xbf16> to vector<8x128xbf16>
    %43 = vector.extract_strided_slice %4 {offsets = [0, 6], sizes = [8, 128], strides = [1, 1]} : vector<8x256xbf16> to vector<8x128xbf16>
    %44 = vector.extract_strided_slice %4 {offsets = [0, 7], sizes = [8, 128], strides = [1, 1]} : vector<8x256xbf16> to vector<8x128xbf16>
    %45 = tpu.concatenate %38, %39, %40, %41, %42, %43, %44 in 0 : vector<8x128xbf16>, vector<8x128xbf16>, vector<8x128xbf16>, vector<8x128xbf16>, vector<8x128xbf16>, vector<8x128xbf16>, vector<8x128xbf16> -> vector<56x128xbf16>
    %c2 = arith.constant 2 : index
    %c0_21 = arith.constant 0 : index
    %c0_22 = arith.constant 0 : index
    %46 = vector.load %arg5[%c2, %c0_21, %c0_22] : memref<4x16x56xbf16, #tpu.memory_space<vmem>>, vector<1x16x56xbf16>
    %47 = vector.shape_cast %46 : vector<1x16x56xbf16> to vector<16x56xbf16>
    %cst_23 = arith.constant dense<0.000000e+00> : vector<16x128xf32>
    %48 = tpu.matmul %47, %45, %cst_23 {dimension_numbers = #tpu.dot_dimension_numbers<[1], [0], [0], [1], [0, 0, 1, 1], [], []>} : vector<16x56xbf16>, vector<56x128xbf16>, vector<16x128xf32> -> vector<16x128xf32>
    %49 = vector.broadcast %5 : vector<16x1xf32> to vector<16x128xf32>
    %50 = arith.addf %48, %49 : vector<16x128xf32>
    %c0_24 = arith.constant 0 : index
    %c2_25 = arith.constant 2 : index
    %c0_26 = arith.constant 0 : index
    %c0_27 = arith.constant 0 : index
    %51 = vector.load %arg7[%c0_24, %c2_25, %c0_26, %c0_27] : memref<1x4x16x128xf32, #tpu.memory_space<vmem>>, vector<1x1x16x128xf32>
    %52 = vector.shape_cast %51 : vector<1x1x16x128xf32> to vector<16x128xf32>
    %53 = vector.shape_cast %50 : vector<16x128xf32> to vector<1x1x16x128xf32>
    tpu.vector_store %arg7[%c0_24, %c2_25, %c0_26, %c0_27], %53 {strides = array<i32>} : memref<1x4x16x128xf32, #tpu.memory_space<vmem>>, vector<1x1x16x128xf32>,
    %54 = vector.extract_strided_slice %4 {offsets = [0, 1], sizes = [8, 128], strides = [1, 1]} : vector<8x256xbf16> to vector<8x128xbf16>
    %55 = vector.extract_strided_slice %4 {offsets = [0, 2], sizes = [8, 128], strides = [1, 1]} : vector<8x256xbf16> to vector<8x128xbf16>
    %56 = vector.extract_strided_slice %4 {offsets = [0, 3], sizes = [8, 128], strides = [1, 1]} : vector<8x256xbf16> to vector<8x128xbf16>
    %57 = vector.extract_strided_slice %4 {offsets = [0, 4], sizes = [8, 128], strides = [1, 1]} : vector<8x256xbf16> to vector<8x128xbf16>
    %58 = vector.extract_strided_slice %4 {offsets = [0, 5], sizes = [8, 128], strides = [1, 1]} : vector<8x256xbf16> to vector<8x128xbf16>
    %59 = vector.extract_strided_slice %4 {offsets = [0, 6], sizes = [8, 128], strides = [1, 1]} : vector<8x256xbf16> to vector<8x128xbf16>
    %60 = vector.extract_strided_slice %4 {offsets = [0, 7], sizes = [8, 128], strides = [1, 1]} : vector<8x256xbf16> to vector<8x128xbf16>
    %61 = tpu.concatenate %54, %55, %56, %57, %58, %59, %60 in 0 : vector<8x128xbf16>, vector<8x128xbf16>, vector<8x128xbf16>, vector<8x128xbf16>, vector<8x128xbf16>, vector<8x128xbf16>, vector<8x128xbf16> -> vector<56x128xbf16>
    %c3 = arith.constant 3 : index
    %c0_28 = arith.constant 0 : index
    %c0_29 = arith.constant 0 : index
    %62 = vector.load %arg5[%c3, %c0_28, %c0_29] : memref<4x16x56xbf16, #tpu.memory_space<vmem>>, vector<1x16x56xbf16>
    %63 = vector.shape_cast %62 : vector<1x16x56xbf16> to vector<16x56xbf16>
    %cst_30 = arith.constant dense<0.000000e+00> : vector<16x128xf32>
    %64 = tpu.matmul %63, %61, %cst_30 {dimension_numbers = #tpu.dot_dimension_numbers<[1], [0], [0], [1], [0, 0, 1, 1], [], []>} : vector<16x56xbf16>, vector<56x128xbf16>, vector<16x128xf32> -> vector<16x128xf32>
    %65 = vector.broadcast %5 : vector<16x1xf32> to vector<16x128xf32>
    %66 = arith.addf %64, %65 : vector<16x128xf32>
    %c0_31 = arith.constant 0 : index
    %c3_32 = arith.constant 3 : index
    %c0_33 = arith.constant 0 : index
    %c0_34 = arith.constant 0 : index
    %67 = vector.load %arg7[%c0_31, %c3_32, %c0_33, %c0_34] : memref<1x4x16x128xf32, #tpu.memory_space<vmem>>, vector<1x1x16x128xf32>
    %68 = vector.shape_cast %67 : vector<1x1x16x128xf32> to vector<16x128xf32>
    %69 = vector.shape_cast %66 : vector<16x128xf32> to vector<1x1x16x128xf32>
    tpu.vector_store %arg7[%c0_31, %c3_32, %c0_33, %c0_34], %69 {strides = array<i32>} : memref<1x4x16x128xf32, #tpu.memory_space<vmem>>, vector<1x1x16x128xf32>,
    return
  }
  func.func @transform_0(%arg0: i32, %arg1: i32, %arg2: i32) -> (i32, i32, i32) {
    %c0_i32 = arith.constant 0 : i32
    %c0_i32_0 = arith.constant 0 : i32
    return %arg1, %c0_i32, %arg2 : i32, i32, i32
  }
  func.func @transform_1(%arg0: i32, %arg1: i32, %arg2: i32) -> (i32, i32, i32) {
    %c1_i32 = arith.constant 1 : i32
    %0 = arith.addi %arg2, %c1_i32 : i32
    %c1_i32_0 = arith.constant 1 : i32
    %1 = arith.muli %0, %c1_i32_0 : i32
    %c0_i32 = arith.constant 0 : i32
    %c0_i32_1 = arith.constant 0 : i32
    return %arg1, %c0_i32, %1 : i32, i32, i32
  }
  func.func @transform_2(%arg0: i32, %arg1: i32, %arg2: i32) -> (i32, i32, i32) {
    %c0_i32 = arith.constant 0 : i32
    %c0_i32_0 = arith.constant 0 : i32
    %c0_i32_1 = arith.constant 0 : i32
    return %c0_i32, %arg0, %c0_i32_0 : i32, i32, i32
  }
  func.func @transform_3(%arg0: i32, %arg1: i32, %arg2: i32) -> (i32, i32) {
    %c0_i32 = arith.constant 0 : i32
    %c0_i32_0 = arith.constant 0 : i32
    return %arg0, %c0_i32 : i32, i32
  }
  func.func @transform_4(%arg0: i32, %arg1: i32, %arg2: i32) -> (i32, i32, i32, i32) {
    %c0_i32 = arith.constant 0 : i32
    %c0_i32_0 = arith.constant 0 : i32
    return %arg1, %c0_i32, %arg0, %arg2 : i32, i32, i32, i32
  }
}

</mosaic_0001>

<bundles_post_ra>
// kernel: tpu_custom_call.1
= control target key start
LH: loop header
LB: loop body
LE: loop exit
PB: predicated region body
PF: predicated region fallthrough
CT: control target
= control target key end

     0   :  { %9 = vsyncpa [#allocation3], 0  ;;  %s1463_s0 = inlined_call_operand.vmem [shape: bf16[2,8,256], index: 0, kind: input, shape index: {}]   ;;  %s1464_s1 = inlined_call_operand.hbm [shape: bf16[2,8,256], index: 1, kind: input, shape index: {}]   ;;  %s1465_s2 = inlined_call_operand.hbm [shape: bf16[4,16,56], index: 2, kind: input, shape index: {}]   ;;  %s1466_s3 = inlined_call_operand.vmem [shape: f32[16,1], index: 3, kind: input, shape index: {}]   ;;  %s1467_s4 = inlined_call_operand.hbm [shape: f32[2,4,16,128], index: 4, kind: output, shape index: {}]  }
   0x1   :  { %11 = vsyncpa [#allocation3 + $0x1], 0 }
   0x2   :  { %12 = vsyncpa [#allocation6], 0 }
   0x3   :  { %13 = vsyncpa [#allocation4], 0 }
   0x4   :  { %15 = vsyncpa [#allocation4 + $0x1], 0  ;;  %s1191_s15 = smov 0   ;;  %s1193_s16 = smov 0  }
   0x5   :  { %s1195_s17 = smov 0   ;;  %s1197_s18 = smov 0  }
   0x6   :  { %s1199_s19 = smov 0   ;;  %s1201_s20 = smov 0  }
   0x7 LB: > { %s806_s21 = sadd.s32 4294967295, %s1148_s20   ;;  %s807_s22 = sadd.s32 4294967294, %s1148_s20   ;;  %s1148_s20 = sphi %s1201_s20, %s21_s20   ;;  %s1144_s19 = sphi %s1199_s19, %s1490_s19   ;;  %s1140_s18 = sphi %s1197_s18, %s1489_s18   ;;  %s1136_s17 = sphi %s1195_s17, %s1488_s17   ;;  %s1132_s16 = sphi %s1193_s16, %s1487_s16   ;;  %s1128_s15 = sphi %s1191_s15, %s1486_s15  }
   0x8   : > { %p92_p0 = scmp.ne.s32.totalorder %s1132_s16, %s1128_s15  ;;  %p1225_p1 = scmp.eq.s32.totalorder %s806_s21, 0 }
   0x9   : > { %p1229_p2 = scmp.eq.s32.totalorder %s806_s21, 1  ;;  %p178_p3 = scmp.eq.s32.totalorder %s807_s22, 1 }
   0xa   : > { %s1472_s23 = scalar_select %p1225_p1, 1, 0 }
   0xb   : > { %s1473_s24 = scalar_select %p1229_p2, 1, 0 }
   0xc   : > { %p1235_p4 = por %p1225_p1, %p92_p0  ;;  %p808_p5 = scmp.ge.s32.totalorder %s1148_s20, 1 }
   0xd   : > { %p1240_p6 = por %p178_p3, %p92_p0  ;;  %p185_p7 = scmp.lt.s32.totalorder %s1148_s20, 3 }
   0xe   : > { %s1474_s25 = scalar_select %p1235_p4, 1, 0 }
   0xf   : > { %s1475_s26 = scalar_select %p1240_p6, 1, 0 }
  0x10   : > { %p1245_p8 = pnand %p808_p5, %p185_p7  ;;  %s1150_s28 = smov [#allocation5]  }
  0x11   : > { %s200_s29 = sshll.u32 %s1150_s28, 4  ;;  %s36_s5 = sadd.s32 1, %s1144_s19  ;;  %s201_s29 = int_to_ptr.vmem [resolvable:$true] %s200_s29 }
  0x12   : > { %s1476_s27 = scalar_select %p1245_p8, 1, 0 }
  0x13   : > { %p919_p9 = pneg %p1245_p8  ;;  %s1003_s8 = scalar_lea.hbm %s1465_s2, 512 }
  0x14   : > { %p1004_p12 = scmp.ne.s32.totalorder %s1465_s2, %s1003_s8  ;;  %p1010_p5 = scmp.lt.u32.totalorder %s1003_s8, %s1465_s2 }
  0x15   : > { %p1254_p11 = pnand %p919_p9, %p1225_p1 }
  0x17   : > { %p1005_p13 = pneg %p1254_p11 }
  0x19   : > { %p1006_p0 = pnand %p1005_p13, %p1004_p12 }
  0x1b   : > { %p1007_p3 = pneg %p1006_p0 }
  0x1d   : > { %p1012_p7 = pnand %p1010_p5, %p1007_p3 }
  0x1f   : > { %1015 = shalt.err (!%p1012_p7)
}
  0x20   : > { %s1016_s13 = scalar_lea.vmem %s201_s29, 512  ;;  %p1024_p1 = scmp.lt.s32.totalorder %s201_s29, %s201_s29 }
  0x21   : > { %p1017_p9 = scmp.ne.s32.totalorder %s201_s29, %s1016_s13  ;;  %p1025_p4 = scmp.lt.s32.totalorder %s1016_s13, %s1016_s13 }
  0x23   : > { %p1019_p10 = pnand %p1017_p9, %p1005_p13  ;;  %p1026_p8 = por %p1025_p4, %p1024_p1 }
  0x25   : > { %p1020_p6 = pneg %p1019_p10 }
  0x27   : > { %p1027_p2 = pnand %p1026_p8, %p1020_p6 }
  0x29   : > { %1030 = shalt.err (!%p1027_p2)
}
  0x2a   : > { %s1151_s14 = smov 64   ;;  %s1152_s21 = smov 4  }
  0x2b   : > { %922 = dma.hbm_to_vmem [thread:$0]  (!%p1254_p11), %s1465_s2, 512, %s201_s29, [#allocation6], %s1151_s14, %s1151_s14, %s1152_s21  }
  0x2c   : > { %p38_p1 = scmp.ge.s32.totalorder %s36_s5, 2  ;;  %p86_p2 = scmp.ne.s32.totalorder %s1136_s17, %s1132_s16 }
  0x2d   : > { %p87_p4 = scmp.eq.s32.totalorder %s1148_s20, 0  ;;  %s79_s6 = sadd.s32 1, %s1136_s17 }
  0x2e   : > { %s1492_s5 = smov (%p38_p1, %s36_s5), 0  ;;  %p1478_p6 = scmp.ne.s32.totalorder %s1473_s24, 0 }
  0x2f   : > { %s74_s8 = ssub.s32 %s1144_s19, %s1492_s5  ;;  %p88_p10 = por %p87_p4, %p86_p2 }
  0x30   : > { %p1283_p8 = por %p1478_p6, %p86_p2  ;;  %p77_p12 = scmp.eq.s32.totalorder %s74_s8, 0 }
  0x31   : > { %s234_s30 = sand.u32 1, %s1136_s17   ;;  %p932_p13 = scmp.lt.s32.totalorder %s1148_s20, 2 }
  0x32   : > { %s812_s9 = sshll.u32 %s234_s30, 2  ;;  %s840_s29 = sshll.u32 %s1144_s19, 7 }
  0x33   : > { %s1292_s10 = scalar_select %p77_p12, %s1136_s17, %s79_s6  }
  0x34   : > { %s712_s13 = scalar_lea.hbm %s1464_s1, %s840_s29  ;;  %s238_s14 = scalar_lea.vmem [#allocation2], %s812_s9 }
  0x35   : > { %s248_s21 = sshll.u32 %s238_s14, 4  ;;  %s1298_s24 = scalar_lea.hbm %s712_s13, 64  ;;  %s1300_s21 = int_to_ptr.vmem [resolvable:$true] %s248_s21 }
  0x36   : > { %p1302_p11 = pnand %p932_p13, %p88_p10  ;;  %s235_s28 = scalar_lea.sflag [#allocation3], %s234_s30 }
  0x37   : > { %s1061_s6 = scalar_lea.hbm %s712_s13, 128  ;;  %s1036_s29 = scalar_lea.hbm %s1464_s1, 256 }
  0x38   : > { %p1032_p0 = scmp.ne.s32.totalorder %s1298_s24, %s1061_s6  ;;  %p1033_p3 = pneg %p1302_p11 }
  0x39   : > { %p1037_p9 = scmp.lt.u32.totalorder %s1298_s24, %s1464_s1  ;;  %p1038_p1 = scmp.lt.u32.totalorder %s1036_s29, %s1061_s6 }
  0x3a   : > { %p1034_p5 = pnand %p1033_p3, %p1032_p0  ;;  %p1040_p4 = scmp.lt.u32.totalorder %s1061_s6, %s1298_s24 }
  0x3b   : > { %p1039_p2 = por %p1038_p1, %p1037_p9 }
  0x3c   : > { %p1035_p7 = pneg %p1034_p5 }
  0x3d   : > { %p1041_p6 = por %p1040_p4, %p1039_p2 }
  0x3f   : > { %p1042_p10 = pnand %p1041_p6, %p1035_p7 }
  0x41   : > { %1045 = shalt.err (!%p1042_p10)
}
  0x42   : > { %s1046_s30 = scalar_lea.vmem %s1300_s21, 64  ;;  %s1153_s13 = smov [#allocation2]  }
  0x43   : > { %p1047_p12 = scmp.ne.s32.totalorder %s1300_s21, %s1046_s30  ;;  %s1051_s14 = sshll.u32 %s1153_s13, 4  ;;  %s1052_s14 = int_to_ptr.vmem [resolvable:$false] %s1051_s14 }
  0x44   : > { %s1053_s8 = scalar_lea.vmem %s1052_s14, 128  ;;  %p1054_p5 = scmp.lt.s32.totalorder %s1300_s21, %s1052_s14 }
  0x45   : > { %p1049_p13 = pnand %p1047_p12, %p1033_p3  ;;  %p1055_p9 = scmp.lt.s32.totalorder %s1053_s8, %s1046_s30 }
  0x47   : > { %p1050_p0 = pneg %p1049_p13  ;;  %p1056_p1 = por %p1055_p9, %p1054_p5 }
  0x49   : > { %p1057_p2 = pnand %p1056_p1, %p1050_p0 }
  0x4b   : > { %1060 = shalt.err (!%p1057_p2)
}
  0x4c   : > { %926 = dma.hbm_to_vmem [thread:$0]  (!%p1302_p11), %s1298_s24, 64, %s1300_s21, %s235_s28  }
  0x4d   : > { %p1481_p7 = scmp.ne.s32.totalorder %s1476_s27, 0 }
  0x4e   : > { %s1333_s6 = sand.u32 (!%p1481_p7), 1, %s1132_s16   ;;  %p1482_p3 = scmp.ne.s32.totalorder (!%p1481_p7), %s1474_s25, 0 }
  0x4f   : > { %257 = sbr.rel (%p1481_p7) target bundleno = 587 (0x24b), region = 36  ;;  %s816_s9 = sshll.u32 (!%p1481_p7), %s1333_s6, 2 }
  0x50   : > { %s260_s29 = scalar_lea.sflag (!%p1481_p7), [#allocation3], %s1333_s6  ;;  %s263_s11 = scalar_lea.vmem (!%p1481_p7), [#allocation2], %s816_s9 }
  0x56   : > { %1115 = dma.done.wait (%p1482_p3), %s260_s29, 64  }
  0x57   : > { %1117 = vsyncadd (%p1482_p3), %s260_s29, 4294967232  ;;  %p1483_p4 = scmp.ne.s32.totalorder %s1472_s23, 0 }
  0x59   : > { %1119 = dma.done.wait (%p1483_p4), [#allocation6], 512  }
  0x5a   : > { %1121 = vsyncadd (%p1483_p4), [#allocation6], 4294966784  ;;  %p305_p11 = scmp.lt.s32.totalorder %s1140_s18, 1  ;;  %v1154_v0 = vmov 0.0   ;;  %v324_v2 = vld [vmem:[%s263_s11] sm:$0xf] }
  0x5b   : > { %863 = vmatprep.subr.bf16.mxu0 %v1154_v0  ;;  %875 = vmatprep.subr.bf16.mxu1 %v1154_v0  ;;  %s1155_s28 = smov 126   ;;  %v330_v4 = vrot.slane %v324_v2, 4  ;;  %s1156_s23 = smov 127   ;;  %vm1161_vm0 = vmmov 0   ;;  %vm335_vm1 = vcmask 1039360   ;;  %vm367_vm2 = vcmask 1043456  }
  0x5c   : > { %s306_s27 = scalar_select %p305_p11, %s1140_s18, 1  ;;  %871 = vmatprep.mubr.msk.bf16.mxu0 %vm1161_vm0, %v1154_v0  ;;  %883 = vmatprep.mubr.msk.bf16.mxu1 %vm1161_vm0, %v1154_v0  ;;  %vm341_vm3 = vcmask 1031168   ;;  %vm347_vm4 = vcmask 1022976   ;;  %vm353_vm5 = vcmask 1014784   ;;  %vm359_vm6 = vcmask 1006592   ;;  %v999_v31 = vld [vmem:[#allocation5] sm:$0xff]  }
  0x5d   : > { %s1157_s12 = smov 125   ;;  %s1158_s30 = smov 124   ;;  %v1162_v23 = vmov 0   ;;  %vm365_vm7 = vcmask 998400   ;;  %v326_v32 = vld [vmem:[%s1466_s3 + $0x8] sm:$0xff]  ;;  %vm397_vm8 = vcmask 457728  }
  0x5e   : > { %s841_s21 = sshll.u32 %s306_s27, 3  ;;  %s1159_s13 = smov 123   ;;  %997 = vset.pattern.permute.xlu0 %v1162_v23  ;;  %998 = vset.pattern.permute.xlu1 %v1162_v23  ;;  %v1000_v33 = vld [vmem:[#allocation5 + $0x8] sm:$0xff]   ;;  %v325_v34 = vld [vmem:[%s1466_s3] sm:$0xff]  ;;  %v1001_v48 = vld [vmem:[#allocation5 + $0x10] sm:$0xff]  }
  0x5f   : > { %s312_s25 = scalar_lea.vmem %s1463_s0, %s841_s21  ;;  %s1160_s14 = smov 122   ;;  %v1002_v49 = vld [vmem:[#allocation5 + $0x18] sm:$0xff]  }
  0x60   : > { %v323_v1 = vld [vmem:[%s312_s25] sm:$0xf]  ;;  %s818_s27 = sshll.u32 %s1333_s6, 6  ;;  %s842_s22 = sshll.u32 %s1140_s18, 10 }
  0x61   : > { %337 = vrot.lane.b32.xlu1 %v323_v1, %s1155_s28  ;;  %v329_v3 = vrot.slane %v323_v1, 4  ;;  %s304_s21 = scalar_lea.vmem [#allocation7], %s818_s27  ;;  %s654_s18 = scalar_lea.sflag [#allocation4], %s1333_s6 }
  0x62   : > { %s670_s24 = sshll.u32 %s304_s21, 4  ;;  %s1414_s24 = int_to_ptr.vmem [resolvable:$true] %s670_s24 }
  0x63   : > { %331 = vrot.lane.b32.xlu0 %v329_v3, %s1156_s23 }
  0x65   : > { %339 = vrot.lane.b32.xlu1 %v324_v2, %s1155_s28 }
  0x67   : > { %333 = vrot.lane.b32.xlu0 %v330_v4, %s1156_s23 }
  0x69   : > { %345 = vrot.lane.b32.xlu1 %v330_v4, %s1157_s12 }
  0x6b   : > { %343 = vrot.lane.b32.xlu0 %v329_v3, %s1157_s12  ;;  %s1062_s12 = scalar_lea.vmem %s1414_s24, 1024 }
  0x6c   : > { %p1063_p6 = scmp.ne.s32.totalorder %s1414_s24, %s1062_s12 }
  0x6d   : > { %351 = vrot.lane.b32.xlu1 %v324_v2, %s1158_s30 }
  0x6e   : > { %p1064_p10 = pnand %p1063_p6, %p1283_p8 }
  0x6f   : > { %349 = vrot.lane.b32.xlu0 %v323_v1, %s1158_s30  ;;  %s1163_s30 = smov [#allocation7]  }
  0x70   : > { %p1065_p12 = pneg %p1064_p10 }
  0x71   : > { %357 = vrot.lane.b32.xlu1 %v330_v4, %s1159_s13 }
  0x73   : > { %355 = vrot.lane.b32.xlu0 %v329_v3, %s1159_s13  ;;  %s1066_s13 = sshll.u32 %s1163_s30, 4  ;;  %s1067_s13 = int_to_ptr.vmem [resolvable:$false] %s1066_s13 }
  0x74   : > { %p1069_p13 = scmp.lt.s32.totalorder %s1414_s24, %s1067_s13 }
  0x75   : > { %363 = vrot.lane.b32.xlu1 %v324_v2, %s1160_s14 }
  0x77   : > { %361 = vrot.lane.b32.xlu0 %v323_v1, %s1160_s14  ;;  %s1068_s14 = scalar_lea.vmem %s1067_s13, 2048 }
  0x78   : > { %p1070_p0 = scmp.lt.s32.totalorder %s1068_s14, %s1062_s12 }
  0x7a   : > { %p1071_p5 = por %p1070_p0, %p1069_p13 }
  0x7c   : > { %p1072_p9 = pnand %p1071_p5, %p1065_p12 }
  0xd3   : > { %v338_v5 = vpop.permute.xlu1 %337 }
  0xd5   : > { %v332_v6 = vpop.permute.xlu0 %331 }
  0xd7   : > { %v340_v7 = vpop.permute.xlu1 %339 }
  0xd8   : > { %v342_v14 = vsel %vm341_vm3, %v338_v5, %v340_v7 }
  0xd9   : > { %v334_v8 = vpop.permute.xlu0 %333 }
  0xda   : > { %v336_v9 = vsel %vm335_vm1, %v332_v6, %v334_v8  ;;  %v504_v10 = vsel %vm367_vm2, %v324_v2, %v334_v8 }
  0xdb   : > { %v346_v11 = vpop.permute.xlu1 %345  ;;  %527 = vrot.lane.b32.xlu1 %v504_v10, %s1156_s23  ;;  %v370_v12 = vsel %vm367_vm2, %v323_v1, %v336_v9 }
  0xdc   : > { %525 = vrot.lane.b32.xlu0 %v370_v12, %s1156_s23  ;;  %864 = vmatpush3.bf16.msra.mxu0 %v370_v12  ;;  %v507_v16 = vsel %vm367_vm2, %v340_v7, %v346_v11 }
  0xdd   : > { %876 = vmatpush3.bf16.msra.mxu1 %v370_v12  ;;  %v344_v13 = vpop.permute.xlu0 %343  ;;  %865 = vmatprep.subr.bf16.mxu0 %v1154_v0 }
  0xde   : > { %v348_v15 = vsel %vm347_vm4, %v344_v13, %v346_v11  ;;  %877 = vmatprep.subr.bf16.mxu1 %v1154_v0 }
  0xdf   : > { %v352_v17 = vpop.permute.xlu1 %351  ;;  %531 = vrot.lane.b32.xlu1 %v507_v16, %s1156_s23  ;;  %v374_v18 = vsel %vm367_vm2, %v342_v14, %v348_v15 }
  0xe0   : > { %529 = vrot.lane.b32.xlu0 %v374_v18, %s1156_s23  ;;  %866 = vmatpush3.bf16.msra.mxu0 %v374_v18 }
  0xe1   : > { %878 = vmatpush3.bf16.msra.mxu1 %v374_v18  ;;  %v350_v19 = vpop.permute.xlu0 %349  ;;  %867 = vmatprep.subr.bf16.mxu0 %v1154_v0 }
  0xe2   : > { %879 = vmatprep.subr.bf16.mxu1 %v1154_v0  ;;  %v354_v24 = vsel %vm353_vm5, %v350_v19, %v352_v17 }
  0xe3   : > { %v358_v20 = vpop.permute.xlu1 %357 }
  0xe4   : > { %v510_v21 = vsel %vm367_vm2, %v352_v17, %v358_v20 }
  0xe5   : > { %535 = vrot.lane.b32.xlu1 %v510_v21, %s1156_s23  ;;  %v356_v22 = vpop.permute.xlu0 %355 }
  0xe6   : > { %v360_v25 = vsel %vm359_vm6, %v356_v22, %v358_v20 }
  0xe7   : > { %v378_v26 = vsel %vm367_vm2, %v354_v24, %v360_v25  ;;  %v364_v27 = vpop.permute.xlu1 %363 }
  0xe8   : > { %533 = vrot.lane.b32.xlu0 %v378_v26, %s1156_s23  ;;  %868 = vmatpush3.bf16.msra.mxu0 %v378_v26 }
  0xe9   : > { %880 = vmatpush3.bf16.msra.mxu1 %v378_v26  ;;  %v362_v28 = vpop.permute.xlu0 %361  ;;  %539 = vrot.lane.b32.xlu1 %v364_v27, %s1156_s23 }
  0xea   : > { %869 = vmatprep.subr.bf16.mxu0 %v1154_v0  ;;  %881 = vmatprep.subr.bf16.mxu1 %v1154_v0  ;;  %v366_v29 = vsel %vm365_vm7, %v362_v28, %v364_v27 }
  0xeb   : > { %v402_v30 = vsel %vm367_vm2, %v366_v29, 0 }
  0xec   : > { %537 = vrot.lane.b32.xlu0 %v366_v29, %s1156_s23  ;;  %870 = vmatpush3.bf16.msra.mxu0 %v402_v30  ;;  %s1412_s23 = scalar_lea.hbm %s1467_s4, %s842_s22 }
  0xed   : > { %882 = vmatpush3.bf16.msra.mxu1 %v402_v30  ;;  %887 = vmatprep.subr.bf16.mxu0 %v1154_v0 }
  0xee   : > { %899 = vmatprep.subr.bf16.mxu1 %v1154_v0  ;;  %389 = vperm.xlu1 %998, %v326_v32  }
  0xef   : > { %872 = vmatmul.mubr.msk.bf16.vlgmr.msra.gmra.mrb[0].mxu0 %vm397_vm8, %v999_v31 }
  0xf0   : > { %884 = vmatmul.mubr.msk.bf16.vlgmr.msra.gmra.mrb[0].mxu1 %vm397_vm8, %v1000_v33  ;;  %895 = vmatprep.mubr.msk.bf16.mxu0 %vm1161_vm0, %v1154_v0 }
  0xf1   : > { %907 = vmatprep.mubr.msk.bf16.mxu1 %vm1161_vm0, %v1154_v0  ;;  %384 = vperm.xlu0 %997, %v325_v34  }
 0x14d   : > { %v528_v35 = vpop.permute.xlu1 %527 }
 0x14e   : > { %v526_v36 = vpop.permute.xlu0 %525 }
 0x14f   : > { %v541_v37 = vsel %vm335_vm1, %v526_v36, %v528_v35 }
 0x150   : > { %888 = vmatpush3.bf16.msra.mxu0 %v541_v37  ;;  %900 = vmatpush3.bf16.msra.mxu1 %v541_v37 }
 0x151   : > { %v532_v38 = vpop.permute.xlu1 %531  ;;  %889 = vmatprep.subr.bf16.mxu0 %v1154_v0  ;;  %901 = vmatprep.subr.bf16.mxu1 %v1154_v0 }
 0x152   : > { %v530_v39 = vpop.permute.xlu0 %529 }
 0x153   : > { %v542_v40 = vsel %vm335_vm1, %v530_v39, %v532_v38 }
 0x154   : > { %890 = vmatpush3.bf16.msra.mxu0 %v542_v40  ;;  %902 = vmatpush3.bf16.msra.mxu1 %v542_v40 }
 0x155   : > { %891 = vmatprep.subr.bf16.mxu0 %v1154_v0  ;;  %903 = vmatprep.subr.bf16.mxu1 %v1154_v0 }
 0x157   : > { %v536_v41 = vpop.permute.xlu1 %535 }
 0x15a   : > { %v534_v42 = vpop.permute.xlu0 %533 }
 0x15b   : > { %v543_v43 = vsel %vm335_vm1, %v534_v42, %v536_v41  ;;  %v540_v44 = vpop.permute.xlu1 %539 }
 0x15c   : > { %892 = vmatpush3.bf16.msra.mxu0 %v543_v43  ;;  %904 = vmatpush3.bf16.msra.mxu1 %v543_v43 }
 0x15d   : > { %893 = vmatprep.subr.bf16.mxu0 %v1154_v0  ;;  %905 = vmatprep.subr.bf16.mxu1 %v1154_v0 }
 0x15e   : > { %v538_v45 = vpop.permute.xlu0 %537 }
 0x15f   : > { %v544_v46 = vsel %vm335_vm1, %v538_v45, %v540_v44 }
 0x160   : > { %v552_v47 = vsel %vm367_vm2, %v544_v46, 0 }
 0x161   : > { %894 = vmatpush3.bf16.msra.mxu0 %v552_v47  ;;  %906 = vmatpush3.bf16.msra.mxu1 %v552_v47 }
 0x164   : > { %896 = vmatmul.mubr.msk.bf16.vlgmr.msra.gmra.mrb[4].mxu0 %vm397_vm8, %v1001_v48  ;;  %908 = vmatmul.mubr.msk.bf16.vlgmr.msra.gmra.mrb[4].mxu1 %vm397_vm8, %v1002_v49 }
 0x16d   : > { %v390_v52 = vpop.permute.xlu1 %389 }
 0x170   : > { %v385_v50 = vpop.permute.xlu0 %384 }
 0x1c2   : > { %v438_v51 = vpop.f32.mrb[0].mxu0 }
 0x1c3   : > { %v492_v53 = vpop.f32.mrb[0].mxu1  ;;  %v873_v54 = vpop.f32.mrb[1].mxu0  ;;  %v439_v55 = vadd.f32 %v438_v51, %v385_v50 }
 0x1c4   : > { %v885_v56 = vpop.f32.mrb[1].mxu1  ;;  %v441_v57 = vpop.f32.mrb[2].mxu0  ;;  %v493_v58 = vadd.f32 %v492_v53, %v385_v50 }
 0x1c5   : > { %v495_v59 = vpop.f32.mrb[2].mxu1  ;;  %v442_v60 = vadd.f32 %v441_v57, %v390_v52  ;;  %v874_v61 = vpop.f32.mrb[3].mxu0  ;;  %445 = vst [vmem:[%s304_s21] sm:$0xff] %v439_v55 }
 0x1c6   : > { %v496_v62 = vadd.f32 %v495_v59, %v390_v52  ;;  %v886_v63 = vpop.f32.mrb[3].mxu1  ;;  %825 = vst [vmem:[%s304_s21 + $0x10] sm:$0xff] %v493_v58 }
 0x1c7   : > { %446 = vst [vmem:[%s304_s21 + $0x8] sm:$0xff] %v442_v60 }
 0x1c8   : > { %826 = vst [vmem:[%s304_s21 + $0x18] sm:$0xff] %v496_v62 }
 0x237   : > { %v588_v0 = vpop.f32.mrb[4].mxu0  ;;  %v643_v1 = vpop.f32.mrb[4].mxu1 }
 0x238   : > { %v589_v2 = vadd.f32 %v588_v0, %v385_v50  ;;  %v644_v3 = vadd.f32 %v643_v1, %v385_v50  ;;  %v897_v4 = vpop.f32.mrb[5].mxu0  ;;  %v909_v5 = vpop.f32.mrb[5].mxu1 }
 0x239   : > { %v591_v6 = vpop.f32.mrb[6].mxu0  ;;  %v646_v7 = vpop.f32.mrb[6].mxu1 }
 0x23a   : > { %829 = vst [vmem:[%s304_s21 + $0x20] sm:$0xff] %v589_v2  ;;  %833 = vst [vmem:[%s304_s21 + $0x30] sm:$0xff] %v644_v3  ;;  %v592_v8 = vadd.f32 %v591_v6, %v390_v52  ;;  %v647_v9 = vadd.f32 %v646_v7, %v390_v52  ;;  %v898_v10 = vpop.f32.mrb[7].mxu0  ;;  %v910_v11 = vpop.f32.mrb[7].mxu1 }
 0x23c   : > { %830 = vst [vmem:[%s304_s21 + $0x28] sm:$0xff] %v592_v8  ;;  %834 = vst [vmem:[%s304_s21 + $0x38] sm:$0xff] %v647_v9 }
 0x23d   : > { %1075 = shalt.err (!%p1072_p9)
}
 0x23e   : > { %s1076_s8 = scalar_lea.hbm %s1412_s23, 1024  ;;  %s1080_s11 = scalar_lea.hbm %s1467_s4, 2048 }
 0x23f   : > { %p1077_p1 = scmp.ne.s32.totalorder %s1412_s23, %s1076_s8  ;;  %p1081_p3 = scmp.lt.u32.totalorder %s1412_s23, %s1467_s4 }
 0x240   : > { %p1082_p4 = scmp.lt.u32.totalorder %s1080_s11, %s1076_s8  ;;  %p1084_p6 = scmp.lt.u32.totalorder %s1076_s8, %s1412_s23 }
 0x241   : > { %p1078_p2 = pnand %p1077_p1, %p1283_p8 }
 0x242   : > { %p1083_p11 = por %p1082_p4, %p1081_p3 }
 0x243   : > { %p1079_p7 = pneg %p1078_p2 }
 0x244   : > { %p1085_p10 = por %p1084_p6, %p1083_p11 }
 0x246   : > { %p1086_p12 = pnand %p1085_p10, %p1079_p7 }
 0x248   : > { %1089 = shalt.err (!%p1086_p12)
}
 0x249   : > { %s1164_s22 = smov 128   ;;  %s1165_s25 = smov 8  }
 0x24a   : > { %917 = dma.vmem_to_hbm [thread:$0]  (%p1283_p8), %s1414_s24, 1024, %s1412_s23, %s654_s18, %s1164_s22, %s1164_s22, %s1165_s25  }
 0x24b PF: > { %s685_s28 = sand.u32 1, %s1128_s15   ;;  %p1484_p13 = scmp.ne.s32.totalorder %s1475_s26, 0 }
 0x24c   : > { %p1485_p0 = scmp.ge.s32.totalorder %s1148_s20, 2  ;;  %s686_s12 = scalar_lea.sflag [#allocation4], %s685_s28 }
 0x24e   : > { %p928_p5 = pnand %p1485_p0, %p1484_p13 }
 0x250   : > { %1123 = dma.done.wait (!%p928_p5), %s686_s12, 1024  }
 0x251   : > { %1125 = vsyncadd (!%p928_p5), %s686_s12, 4294966272  ;;  %s21_s20 = sadd.s32 1, %s1148_s20   ;;  %s1486_s15 = smov %s1132_s16 }
 0x252   : > { %p18_p9 = scmp.ge.s32.totalorder %s21_s20, 4   ;;  %s1487_s16 = smov %s1136_s17 }
 0x253   : > { %s1488_s17 = smov %s1292_s10  ;;  %s1489_s18 = smov %s1144_s19 }
 0x254   : > { %s1490_s19 = smov %s1492_s5  ;;  %20 = sbr.rel (!%p18_p9) target bundleno = 7 (0x7), region = 98 }
 0x25b   :  { %691 = vsyncpa [#allocation3], 1 }
 0x25c   :  { %693 = vsyncpa [#allocation3 + $0x1], 1 }
 0x25d   :  { %694 = vsyncpa [#allocation6], 1 }
 0x25e   :  { %695 = vsyncpa [#allocation4], 1 }
 0x25f   :  { %697 = vsyncpa [#allocation4 + $0x1], 1 }

</bundles_post_ra>
